<compile_context>
chip_gen: v7x
topology: tpu7x:2x2x1
jax: 0.10.0
libtpu: 0.0.40
codegen_flags: <defaults>
</compile_context>

<pallas_src>
import jax
import jax.numpy as jnp
from jax.experimental import pallas as pl
from jax.experimental.pallas import tpu as pltpu


def _gckb_kernel(x_ref, wbig_ref, bbig_ref, wfc_ref, bfc_ref, out_ref):
    # x_ref:   (TB, K)      flattened (L, D) samples, K = L*D
    # wbig_ref:(K, 3P)      [seq | hr | rt] block-diagonal-over-D weights (zero padded)
    # bbig_ref:(1, 3P)      matching biases (zero padded)
    # wfc_ref: (8, P)       row 0 = FC weights in c*D + d order (zero padded), rows 1..7 zero
    # bfc_ref: (1, 1)       FC bias
    # out_ref: (1, 1, TB)   lane-dense per-tile predictions
    P = wfc_ref.shape[1]

    x2 = x_ref[...]                                                    # (TB, K)
    h = jnp.dot(x2, wbig_ref[...],
                preferred_element_type=jnp.float32) + bbig_ref[...]    # (TB, 3P)

    seq = h[:, 0:P]                                                    # (TB, P)
    hr = h[:, P:2 * P]                                                 # (TB, P)
    rt = h[:, 2 * P:3 * P]                                             # (TB, P)

    # ReLU(conv_out) * sigmoid(hr * rt); padded lanes are exactly zero because
    # their seq weights/bias are zero => relu(0) = 0.
    y = jnp.maximum(seq, 0.0) * jax.nn.sigmoid(hr * rt)                # (TB, P)
    # TODO(synk): dropout is identity (eval mode), so it is omitted.

    # FC reduction: (8, P) x (TB, P)^T -> (8, TB); only row 0 carries real weights.
    pred = jax.lax.dot_general(wfc_ref[...], y, (((1,), (1,)), ((), ())),
                               preferred_element_type=jnp.float32)     # (8, TB)
    out_ref[0] = pred[0:1, :] + bfc_ref[...]                           # (1, TB), lane-dense


def gckb_forward(x, params, tb=512):
    """x: (B, L, D) float32 — same convention as the PyTorch forward input."""
    B, L, D = x.shape
    C = params["w_seq"].shape[0]
    CD = C * D
    K = L * D
    P = pl.cdiv(CD, 128) * 128               # per-branch lane-aligned width
    f32 = jnp.float32

    # Lane-dense batch tile: multiple of 128, no larger than the (padded) batch.
    tb = max(128, (int(tb) // 128) * 128)
    tb = min(tb, pl.cdiv(B, 128) * 128)
    b_pad = pl.cdiv(B, tb) * tb
    nb = b_pad // tb

    # Free row-major reshape (no transpose / no extra HBM pass); pad batch if needed.
    x2 = x.astype(f32).reshape(B, K)
    if b_pad != B:
        x2 = jnp.pad(x2, ((0, b_pad - B), (0, 0)))

    # Fused conv weights: the (1,L)/(1,L-1) convs over the L axis, expressed as one
    # matmul on the flattened (l*D + d) input via a kron-with-identity block structure.
    eye = jnp.eye(D, dtype=f32)
    zrow = jnp.zeros((1, C), f32)
    w_seq_t = params["w_seq"].astype(f32).T                              # (L, C)
    w_hr_t = jnp.concatenate([params["w_hr"].astype(f32).T, zrow], 0)    # (L, C): no x[L-1] term
    w_rt_t = jnp.concatenate([zrow, params["w_rt"].astype(f32).T], 0)    # (L, C): no x[0] term

    def branch_w(wt):       # (L, C) -> (K, P); output feature order is c*D + d
        return jnp.pad(jnp.kron(wt, eye), ((0, 0), (0, P - CD)))

    def branch_b(bv):       # (C,) -> (1, P); feature order c*D + d
        return jnp.pad(jnp.kron(bv.astype(f32), jnp.ones((D,), f32)), (0, P - CD))[None, :]

    w_big = jnp.concatenate([branch_w(w_seq_t), branch_w(w_hr_t), branch_w(w_rt_t)],
                            axis=1)                                      # (K, 3P)
    b_big = jnp.concatenate([branch_b(params["b_seq"]), branch_b(params["b_hr"]),
                             branch_b(params["b_rt"])], axis=1)          # (1, 3P)

    # PyTorch FC flatten order is c*D + d, which matches our column order directly.
    wfc = jnp.pad(params["w_fc"].astype(f32).reshape(CD), (0, P - CD))   # (P,)
    wfc8 = jnp.zeros((8, P), f32).at[0].set(wfc)                         # (8, P)
    bfc = params["b_fc"].astype(f32).reshape(1, 1)

    out = pl.pallas_call(
        _gckb_kernel,
        out_shape=jax.ShapeDtypeStruct((nb, 1, tb), f32),
        grid_spec=pltpu.PrefetchScalarGridSpec(
            num_scalar_prefetch=0,
            grid=(nb,),
            in_specs=[
                pl.BlockSpec((tb, K), lambda b: (b, 0)),
                pl.BlockSpec((K, 3 * P), lambda b: (0, 0)),
                pl.BlockSpec((1, 3 * P), lambda b: (0, 0)),
                pl.BlockSpec((8, P), lambda b: (0, 0)),
                pl.BlockSpec((1, 1), lambda b: (0, 0)),
            ],
            out_specs=pl.BlockSpec((1, 1, tb), lambda b: (b, 0, 0)),
        ),
        compiler_params=pltpu.CompilerParams(dimension_semantics=("parallel",)),
    )(x2, w_big, b_big, wfc8, bfc)

    return out.reshape(b_pad, 1)[:B]


def gckb_reference(x, p):
    """Pure-JAX reference matching the PyTorch forward (eval mode)."""
    B, L, D = x.shape
    xt = jnp.transpose(x, (0, 2, 1))                                    # (B, D, L)
    seq = jnp.einsum("bdl,cl->bcd", xt, p["w_seq"]) + p["b_seq"][None, :, None]
    hr = jnp.einsum("bdl,cl->bcd", xt[:, :, :-1], p["w_hr"]) + p["b_hr"][None, :, None]
    rt = jnp.einsum("bdl,cl->bcd", xt[:, :, 1:], p["w_rt"]) + p["b_rt"][None, :, None]
    y = jax.nn.relu(seq) * jax.nn.sigmoid(hr * rt)                      # (B, C, D)
    f = y.reshape(B, -1)
    return f @ p["w_fc"].T + p["b_fc"]


def init_params(key, input_dim, input_seq_len, out_channels):
    # Deterministic synthetic init (in_channels = 1, as implied by forward's unsqueeze(1)).
    ks = jax.random.split(key, 8)
    s = 0.1
    return {
        "w_seq": s * jax.random.normal(ks[0], (out_channels, input_seq_len), jnp.float32),
        "b_seq": s * jax.random.normal(ks[1], (out_channels,), jnp.float32),
        "w_hr": s * jax.random.normal(ks[2], (out_channels, input_seq_len - 1), jnp.float32),
        "b_hr": s * jax.random.normal(ks[3], (out_channels,), jnp.float32),
        "w_rt": s * jax.random.normal(ks[4], (out_channels, input_seq_len - 1), jnp.float32),
        "b_rt": s * jax.random.normal(ks[5], (out_channels,), jnp.float32),
        "w_fc": s * jax.random.normal(ks[6], (1, input_dim * out_channels), jnp.float32),
        "b_fc": s * jax.random.normal(ks[7], (1,), jnp.float32),
    }


if __name__ == "__main__":
    B = 2             # batch
    L = 8             # input_seq_len
    D = 16            # input_dim
    C = 4             # out_channels

    key = jax.random.PRNGKey(0)
    k_x, k_p, k_x2 = jax.random.split(key, 3)
    x = jax.random.normal(k_x, (B, L, D), jnp.float32)      # (batch, length, dim)
    params = init_params(k_p, D, L, C)

    pred = gckb_forward(x, params)
    pred = jax.block_until_ready(pred)
    ref = gckb_reference(x, params)
    assert pred.shape == (B, 1)
    assert jnp.allclose(pred, ref, atol=1e-3, rtol=1e-3), (pred, ref)

    # Extra check: multiple batch tiles + batch padding path.
    B2 = 300
    x_big = jax.random.normal(k_x2, (B2, L, D), jnp.float32)
    pred_big = jax.block_until_ready(gckb_forward(x_big, params, tb=128))
    ref_big = gckb_reference(x_big, params)
    assert pred_big.shape == (B2, 1)
    assert jnp.allclose(pred_big, ref_big, atol=1e-3, rtol=1e-3)

    print("KERNEL_OK")
</pallas_src>

<mosaic_0001>
module attributes {stable_mosaic.version = 11 : i64} {
  func.func @_gckb_kernel(%arg0: i32, %arg1: memref<128x128xf32, #tpu.memory_space<vmem>>, %arg2: memref<128x384xf32, #tpu.memory_space<vmem>>, %arg3: memref<1x384xf32, #tpu.memory_space<vmem>>, %arg4: memref<8x128xf32, #tpu.memory_space<vmem>>, %arg5: memref<1x1xf32, #tpu.memory_space<vmem>>, %arg6: memref<1x1x128xf32, #tpu.memory_space<vmem>>) attributes {dimension_semantics = [#tpu.dimension_semantics<parallel>], iteration_bounds = array<i64: 1>, scalar_prefetch = 0 : i64, scratch_operands = 0 : i64, tpu.core_type = #tpu.core_type<tc>, window_params = [{transform_indices = @transform_0, window_bounds = array<i64: 128, 128>}, {pipeline_mode = #tpu.pipeline_mode<synchronous>, transform_indices = @transform_1, window_bounds = array<i64: 128, 384>}, {pipeline_mode = #tpu.pipeline_mode<synchronous>, transform_indices = @transform_2, window_bounds = array<i64: 1, 384>}, {pipeline_mode = #tpu.pipeline_mode<synchronous>, transform_indices = @transform_3, window_bounds = array<i64: 8, 128>}, {pipeline_mode = #tpu.pipeline_mode<synchronous>, transform_indices = @transform_4, window_bounds = array<i64: 1, 1>}, {transform_indices = @transform_5, window_bounds = array<i64: 1, 1, 128>}]} {
    %c0 = arith.constant 0 : index
    %c0_0 = arith.constant 0 : index
    %0 = vector.load %arg1[%c0, %c0_0] : memref<128x128xf32, #tpu.memory_space<vmem>>, vector<128x128xf32>
    %c0_1 = arith.constant 0 : index
    %c0_2 = arith.constant 0 : index
    %1 = vector.load %arg2[%c0_1, %c0_2] : memref<128x384xf32, #tpu.memory_space<vmem>>, vector<128x384xf32>
    %cst = arith.constant dense<0.000000e+00> : vector<128x384xf32>
    %2 = tpu.matmul %0, %1, %cst {dimension_numbers = #tpu.dot_dimension_numbers<[1], [0], [0], [1], [0, 0, 1, 1], [], []>} : vector<128x128xf32>, vector<128x384xf32>, vector<128x384xf32> -> vector<128x384xf32>
    %c0_3 = arith.constant 0 : index
    %c0_4 = arith.constant 0 : index
    %3 = vector.load %arg3[%c0_3, %c0_4] : memref<1x384xf32, #tpu.memory_space<vmem>>, vector<1x384xf32>
    %4 = vector.broadcast %3 : vector<1x384xf32> to vector<128x384xf32>
    %5 = arith.addf %2, %4 : vector<128x384xf32>
    %6 = vector.extract_strided_slice %5 {offsets = [0, 0], sizes = [128, 128], strides = [1, 1]} : vector<128x384xf32> to vector<128x128xf32>
    %7 = vector.extract_strided_slice %5 {offsets = [0, 128], sizes = [128, 128], strides = [1, 1]} : vector<128x384xf32> to vector<128x128xf32>
    %8 = vector.extract_strided_slice %5 {offsets = [0, 256], sizes = [128, 128], strides = [1, 1]} : vector<128x384xf32> to vector<128x128xf32>
    %cst_5 = arith.constant 0.000000e+00 : f32
    %9 = vector.broadcast %cst_5 : f32 to vector<128x128xf32>
    %10 = arith.maximumf %6, %9 : vector<128x128xf32>
    %11 = arith.mulf %7, %8 : vector<128x128xf32>
    %12 = arith.negf %11 : vector<128x128xf32>
    %13 = math.exp %12 : vector<128x128xf32>
    %cst_6 = arith.constant 1.000000e+00 : f32
    %14 = vector.broadcast %cst_6 : f32 to vector<128x128xf32>
    %15 = arith.addf %14, %13 : vector<128x128xf32>
    %16 = arith.divf %14, %15 : vector<128x128xf32>
    %17 = arith.mulf %10, %16 : vector<128x128xf32>
    %c0_7 = arith.constant 0 : index
    %c0_8 = arith.constant 0 : index
    %18 = vector.load %arg4[%c0_7, %c0_8] : memref<8x128xf32, #tpu.memory_space<vmem>>, vector<8x128xf32>
    %cst_9 = arith.constant dense<0.000000e+00> : vector<8x128xf32>
    %19 = tpu.matmul %18, %17, %cst_9 {dimension_numbers = #tpu.dot_dimension_numbers<[1], [1], [0], [0], [0, 0, 1, 0], [], []>} : vector<8x128xf32>, vector<128x128xf32>, vector<8x128xf32> -> vector<8x128xf32>
    %20 = vector.extract_strided_slice %19 {offsets = [0, 0], sizes = [1, 128], strides = [1, 1]} : vector<8x128xf32> to vector<1x128xf32>
    %c0_10 = arith.constant 0 : index
    %c0_11 = arith.constant 0 : index
    %21 = vector.load %arg5[%c0_10, %c0_11] : memref<1x1xf32, #tpu.memory_space<vmem>>, vector<1x1xf32>
    %22 = vector.broadcast %21 : vector<1x1xf32> to vector<1x128xf32>
    %23 = arith.addf %20, %22 : vector<1x128xf32>
    %c0_12 = arith.constant 0 : index
    %c0_13 = arith.constant 0 : index
    %c0_14 = arith.constant 0 : index
    %24 = vector.load %arg6[%c0_12, %c0_13, %c0_14] : memref<1x1x128xf32, #tpu.memory_space<vmem>>, vector<1x1x128xf32>
    %25 = vector.shape_cast %24 : vector<1x1x128xf32> to vector<1x128xf32>
    %26 = vector.shape_cast %23 : vector<1x128xf32> to vector<1x1x128xf32>
    tpu.vector_store %arg6[%c0_12, %c0_13, %c0_14], %26 {strides = array<i32>} : memref<1x1x128xf32, #tpu.memory_space<vmem>>, vector<1x1x128xf32>,
    return
  }
  func.func @transform_0(%arg0: i32) -> (i32, i32) {
    %c0_i32 = arith.constant 0 : i32
    %c0_i32_0 = arith.constant 0 : i32
    return %arg0, %c0_i32 : i32, i32
  }
  func.func @transform_1(%arg0: i32) -> (i32, i32) {
    %c0_i32 = arith.constant 0 : i32
    %c0_i32_0 = arith.constant 0 : i32
    %c0_i32_1 = arith.constant 0 : i32
    return %c0_i32, %c0_i32_0 : i32, i32
  }
  func.func @transform_2(%arg0: i32) -> (i32, i32) {
    %c0_i32 = arith.constant 0 : i32
    %c0_i32_0 = arith.constant 0 : i32
    %c0_i32_1 = arith.constant 0 : i32
    return %c0_i32, %c0_i32_0 : i32, i32
  }
  func.func @transform_3(%arg0: i32) -> (i32, i32) {
    %c0_i32 = arith.constant 0 : i32
    %c0_i32_0 = arith.constant 0 : i32
    %c0_i32_1 = arith.constant 0 : i32
    return %c0_i32, %c0_i32_0 : i32, i32
  }
  func.func @transform_4(%arg0: i32) -> (i32, i32) {
    %c0_i32 = arith.constant 0 : i32
    %c0_i32_0 = arith.constant 0 : i32
    %c0_i32_1 = arith.constant 0 : i32
    return %c0_i32, %c0_i32_0 : i32, i32
  }
  func.func @transform_5(%arg0: i32) -> (i32, i32, i32) {
    %c0_i32 = arith.constant 0 : i32
    %c0_i32_0 = arith.constant 0 : i32
    %c0_i32_1 = arith.constant 0 : i32
    return %arg0, %c0_i32, %c0_i32_0 : i32, i32, i32
  }
}

</mosaic_0001>

<bundles_post_ra>
// kernel: tpu_custom_call.1
= control target key start
LH: loop header
LB: loop body
LE: loop exit
PB: predicated region body
PF: predicated region fallthrough
CT: control target
= control target key end

     0   :  { %s1313_s0 = inlined_call_operand.hbm [shape: f32[128,128], index: 0, kind: input, shape index: {}]   ;;  %s1314_s1 = inlined_call_operand.hbm [shape: f32[128,384], index: 1, kind: input, shape index: {}]   ;;  %s1315_s2 = inlined_call_operand.vmem [shape: f32[1,384], index: 2, kind: input, shape index: {}]   ;;  %s1316_s3 = inlined_call_operand.vmem [shape: f32[8,128], index: 3, kind: input, shape index: {}]   ;;  %s1317_s4 = inlined_call_operand.<no memory space> [shape: f32[1,1], index: 4, kind: input, shape index: {}]   ;;  %s1318_s5 = inlined_call_operand.hbm [shape: f32[1,1,128], index: 5, kind: output, shape index: {}]  }
   0x1   :  { %v10_v0 = vstv %s1317_s4 }
   0x2   :  { %11 = vst [vmem:[#allocation2] sm:$0x1] %v10_v0 }
   0x3   :  { %12 = vsyncpa [#allocation4], 0 }
   0x4   :  { %13 = vsyncpa [#allocation7], 0 }
   0x5   :  { %14 = vsyncpa [#allocation5], 0  ;;  %s1073_s20 = smov [#allocation3]   ;;  %s1001_s24 = scalar_lea.hbm %s1313_s0, 2048 }
   0x6   :  { %s20_s21 = sshll.u32 %s1073_s20, 4  ;;  %p1002_p0 = scmp.ne.s32.totalorder %s1313_s0, %s1001_s24  ;;  %s21_s21 = int_to_ptr.vmem [resolvable:$true] %s20_s21 }
   0x7   :  { %p1005_p1 = scmp.lt.u32.totalorder %s1001_s24, %s1313_s0 }
   0x9   :  { %p1007_p2 = pnand %p1005_p1, %p1002_p0 }
   0xb   :  { %1010 = shalt.err (!%p1007_p2)
}
   0xc   :  { %s1011_s4 = scalar_lea.vmem %s21_s21, 2048  ;;  %p1016_p4 = scmp.lt.s32.totalorder %s21_s21, %s21_s21 }
   0xd   :  { %p1012_p3 = scmp.ne.s32.totalorder %s21_s21, %s1011_s4  ;;  %p1017_p5 = scmp.lt.s32.totalorder %s1011_s4, %s1011_s4 }
   0xf   :  { %p1018_p6 = por %p1017_p5, %p1016_p4 }
  0x11   :  { %p1019_p7 = pnand %p1018_p6, %p1012_p3 }
  0x13   :  { %1022 = shalt.err (!%p1019_p7)
}
  0x14   :  { %s1074_s29 = smov 128   ;;  %s1075_s30 = smov 8  }
  0x15   :  { %26 = dma.hbm_to_vmem [thread:$0]  %s1313_s0, 2048, %s21_s21, [#allocation4], %s1074_s29, %s1074_s29, %s1075_s30  }
  0x16   :  { %s1076_s8 = smov [#allocation6]   ;;  %s1023_s12 = scalar_lea.hbm %s1314_s1, 6144 }
  0x17   :  { %s32_s9 = sshll.u32 %s1076_s8, 4  ;;  %p1024_p8 = scmp.ne.s32.totalorder %s1314_s1, %s1023_s12  ;;  %s33_s9 = int_to_ptr.vmem [resolvable:$true] %s32_s9 }
  0x18   :  { %p1027_p9 = scmp.lt.u32.totalorder %s1023_s12, %s1314_s1 }
  0x1a   :  { %p1029_p10 = pnand %p1027_p9, %p1024_p8 }
  0x1c   :  { %1032 = shalt.err (!%p1029_p10)
}
  0x1d   :  { %s1033_s17 = scalar_lea.vmem %s33_s9, 6144  ;;  %p1038_p12 = scmp.lt.s32.totalorder %s33_s9, %s33_s9 }
  0x1e   :  { %p1034_p11 = scmp.ne.s32.totalorder %s33_s9, %s1033_s17  ;;  %p1039_p13 = scmp.lt.s32.totalorder %s1033_s17, %s1033_s17 }
  0x20   :  { %p1040_p0 = por %p1039_p13, %p1038_p12 }
  0x22   :  { %p1041_p1 = pnand %p1040_p0, %p1034_p11 }
  0x24   :  { %1044 = shalt.err (!%p1041_p1)
}
  0x25   :  { %s1077_s0 = smov 384   ;;  %s1078_s18 = smov 24  }
  0x26   :  { %38 = dma.hbm_to_vmem [thread:$0]  %s1314_s1, 6144, %s33_s9, [#allocation7], %s1077_s0, %s1077_s0, %s1078_s18  }
  0x27   :  { %1067 = dma.done.wait [#allocation4], 2048  }
  0x28   :  { %1068 = vsyncadd [#allocation4], 4294965248 }
  0x29   :  { %1069 = dma.done.wait [#allocation7], 6144  }
  0x2a   :  { %1070 = vsyncadd [#allocation7], 4294961152  ;;  %v1079_v1 = vmov 0.0   ;;  %v68_v2 = vld [vmem:[#allocation6 + $0x8] sm:$0xff]  ;;  %v71_v3 = vld [vmem:[#allocation6 + $0x20] sm:$0xff]  ;;  %vm1081_vm0 = vmmov 0  }
  0x2b   :  { %196 = vmatprep.mubr.f32.mxu0 %v1079_v1  ;;  %v69_v4 = vld [vmem:[#allocation6 + $0x10] sm:$0xff]  ;;  %v837_v5 = vpack.c.bf16 %v71_v3, %v68_v2  ;;  %v72_v6 = vld [vmem:[#allocation6 + $0x28] sm:$0xff]  ;;  %v67_v7 = vld [vmem:[#allocation6] sm:$0xff]  ;;  %s1083_s23 = smov [#allocation8]  }
  0x2c   :  { %v70_v8 = vld [vmem:[#allocation6 + $0x18] sm:$0xff]  ;;  %v869_v9 = vpack.c.bf16 %v72_v6, %v69_v4  ;;  %v77_v12 = vld [vmem:[#allocation6 + $0x50] sm:$0xff]  ;;  %v75_v13 = vld [vmem:[#allocation6 + $0x40] sm:$0xff]  ;;  %s671_s24 = sshll.u32 %s1083_s23, 4  ;;  %s672_s24 = int_to_ptr.vmem [resolvable:$true] %s671_s24 }
  0x2d   :  { %v839_v10 = vpack.c.bf16 %v70_v8, %v67_v7  ;;  %v74_v11 = vld [vmem:[#allocation6 + $0x38] sm:$0xff]  ;;  %838 = vmatprep.subr.bf16.mxu0 %v837_v5  ;;  %v73_v16 = vld [vmem:[#allocation6 + $0x30] sm:$0xff]  ;;  %v76_v17 = vld [vmem:[#allocation6 + $0x48] sm:$0xff]  ;;  %s1045_s25 = scalar_lea.vmem %s672_s24, 16  ;;  %s1049_s26 = scalar_lea.vmem %s672_s24, 32 }
  0x2e   :  { %v841_v14 = vpack.c.bf16 %v77_v12, %v74_v11  ;;  %v78_v15 = vld [vmem:[#allocation6 + $0x58] sm:$0xff]  ;;  %870 = vmatprep.subr.bf16.mxu1 %v869_v9  ;;  %v843_v19 = vpack.c.bf16 %v76_v17, %v73_v16  ;;  %v80_v20 = vld [vmem:[#allocation6 + $0x68] sm:$0xff]  ;;  %v83_v21 = vld [vmem:[#allocation6 + $0x80] sm:$0xff]  ;;  %p1046_p2 = scmp.ne.s32.totalorder %s672_s24, %s1045_s25  ;;  %p1050_p3 = scmp.lt.s32.totalorder %s672_s24, %s672_s24 }
  0x2f   :  { %840 = vmatpush1.bf16.msra.mxu0 %v839_v10  ;;  %v873_v18 = vpack.c.bf16 %v78_v15, %v75_v13  ;;  %v81_v22 = vld [vmem:[#allocation6 + $0x70] sm:$0xff]  ;;  %872 = vmatpush3.bf16.msra.mxu1 %v869_v9  ;;  %v845_v23 = vpack.c.bf16 %v83_v21, %v80_v20  ;;  %v84_v24 = vld [vmem:[#allocation6 + $0x88] sm:$0xff]  ;;  %v79_v25 = vld [vmem:[#allocation6 + $0x60] sm:$0xff]  ;;  %p1051_p4 = scmp.lt.s32.totalorder %s1049_s26, %s1045_s25 }
  0x30   :  { %842 = vmatprep.subr.bf16.mxu0 %v841_v14  ;;  %v82_v26 = vld [vmem:[#allocation6 + $0x78] sm:$0xff]  ;;  %v877_v27 = vpack.c.bf16 %v84_v24, %v81_v22  ;;  %v89_v29 = vld [vmem:[#allocation6 + $0xb0] sm:$0xff]  ;;  %v87_v30 = vld [vmem:[#allocation6 + $0xa0] sm:$0xff] }
  0x31   :  { %874 = vmatprep.subr.bf16.mxu1 %v873_v18  ;;  %v86_v28 = vld [vmem:[#allocation6 + $0x98] sm:$0xff]  ;;  %v847_v32 = vpack.c.bf16 %v82_v26, %v79_v25  ;;  %v85_v34 = vld [vmem:[#allocation6 + $0x90] sm:$0xff]  ;;  %v88_v35 = vld [vmem:[#allocation6 + $0xa8] sm:$0xff]  ;;  %p1052_p5 = por %p1051_p4, %p1050_p3 }
  0x32   :  { %v90_v31 = vld [vmem:[#allocation6 + $0xb8] sm:$0xff]  ;;  %v849_v33 = vpack.c.bf16 %v89_v29, %v86_v28  ;;  %v92_v37 = vld [vmem:[#allocation6 + $0xc8] sm:$0xff]  ;;  %v95_v38 = vld [vmem:[#allocation6 + $0xe0] sm:$0xff]  ;;  %v851_v41 = vpack.c.bf16 %v88_v35, %v85_v34  ;;  %v1082_v29 = vmov 0  }
  0x33   :  { %844 = vmatpush1.bf16.msra.mxu0 %v843_v19  ;;  %876 = vmatpush3.bf16.msra.mxu1 %v873_v18  ;;  %v881_v36 = vpack.c.bf16 %v90_v31, %v87_v30  ;;  %v93_v39 = vld [vmem:[#allocation6 + $0xd0] sm:$0xff]  ;;  %v96_v40 = vld [vmem:[#allocation6 + $0xe8] sm:$0xff]  ;;  %v853_v42 = vpack.c.bf16 %v95_v38, %v92_v37  ;;  %v91_v43 = vld [vmem:[#allocation6 + $0xc0] sm:$0xff]  ;;  %v117_v30 = vlaneseq  ;;  %p1053_p6 = pnand %p1052_p5, %p1046_p2 }
  0x34   :  { %846 = vmatprep.subr.bf16.mxu0 %v845_v23  ;;  %878 = vmatprep.subr.bf16.mxu1 %v877_v27  ;;  %v94_v44 = vld [vmem:[#allocation6 + $0xd8] sm:$0xff]  ;;  %v885_v45 = vpack.c.bf16 %v96_v40, %v93_v39  ;;  %v101_v47 = vld [vmem:[#allocation6 + $0x110] sm:$0xff]  ;;  %v99_v48 = vld [vmem:[#allocation6 + $0x100] sm:$0xff] }
  0x35   :  { %v98_v46 = vld [vmem:[#allocation6 + $0xf8] sm:$0xff]  ;;  %v855_v50 = vpack.c.bf16 %v94_v44, %v91_v43  ;;  %v51_v51 = vld [vmem:[#allocation3] sm:$0xff]  ;;  %v97_v53 = vld [vmem:[#allocation6 + $0xf0] sm:$0xff]  ;;  %936 = vset.pattern.permute.xlu0 %v1082_v29  ;;  %v1159_v31 = vshrl.u32 %v117_v30, 7 }
  0x36   :  { %v102_v49 = vld [vmem:[#allocation6 + $0x118] sm:$0xff]  ;;  %v857_v52 = vpack.c.bf16 %v101_v47, %v98_v46  ;;  %v100_v54 = vld [vmem:[#allocation6 + $0x108] sm:$0xff]  ;;  %v107_v57 = vld [vmem:[#allocation6 + $0x140] sm:$0xff]  ;;  %778 = vmatprep.mubr.f32.mxu1 %v51_v51 }
  0x37   :  { %848 = vmatpush1.bf16.msra.mxu0 %v847_v32  ;;  %880 = vmatpush3.bf16.msra.mxu1 %v877_v27  ;;  %v889_v55 = vpack.c.bf16 %v102_v49, %v99_v48  ;;  %v104_v56 = vld [vmem:[#allocation6 + $0x128] sm:$0xff]  ;;  %v105_v58 = vld [vmem:[#allocation6 + $0x130] sm:$0xff]  ;;  %v859_v60 = vpack.c.bf16 %v100_v54, %v97_v53  ;;  %v103_v62 = vld [vmem:[#allocation6 + $0x120] sm:$0xff]  ;;  %v1080_v27 = vmov 0.0|0.0   ;;  %v123_v32 = vsub.s32 1, %v1159_v31 }
  0x38   :  { %850 = vmatprep.subr.bf16.mxu0 %v849_v33  ;;  %882 = vmatprep.subr.bf16.mxu1 %v881_v36  ;;  %v108_v59 = vld [vmem:[#allocation6 + $0x148] sm:$0xff]  ;;  %v861_v61 = vpack.c.bf16 %v107_v57, %v104_v56  ;;  %v106_v63 = vld [vmem:[#allocation6 + $0x138] sm:$0xff]  ;;  %v113_v3 = vld [vmem:[#allocation6 + $0x170] sm:$0xff]  ;;  %v127_v34 = vsub.s32 2, %v1159_v31 }
  0x39   :  { %v893_v0 = vpack.c.bf16 %v108_v59, %v105_v58  ;;  %v110_v2 = vld [vmem:[#allocation6 + $0x158] sm:$0xff]  ;;  %v111_v4 = vld [vmem:[#allocation6 + $0x160] sm:$0xff]  ;;  %v863_v6 = vpack.c.bf16 %v106_v63, %v103_v62  ;;  %v109_v8 = vld [vmem:[#allocation6 + $0x150] sm:$0xff] }
  0x3a   :  { %v114_v5 = vld [vmem:[#allocation6 + $0x178] sm:$0xff]  ;;  %v865_v7 = vpack.c.bf16 %v113_v3, %v110_v2  ;;  %v112_v9 = vld [vmem:[#allocation6 + $0x168] sm:$0xff]  ;;  %v53_v13 = vld [vmem:[#allocation3 + $0x10] sm:$0xff] }
  0x3b   :  { %852 = vmatpush1.bf16.msra.mxu0 %v851_v41  ;;  %884 = vmatpush3.bf16.msra.mxu1 %v881_v36  ;;  %v897_v10 = vpack.c.bf16 %v114_v5, %v111_v4  ;;  %v867_v11 = vpack.c.bf16 %v112_v9, %v109_v8  ;;  %v52_v12 = vld [vmem:[#allocation3 + $0x8] sm:$0xff]  ;;  %v54_v14 = vld [vmem:[#allocation3 + $0x18] sm:$0xff]  ;;  %v55_v15 = vld [vmem:[#allocation3 + $0x20] sm:$0xff] }
  0x3c   :  { %854 = vmatprep.subr.bf16.mxu0 %v853_v42  ;;  %886 = vmatprep.subr.bf16.mxu1 %v885_v45  ;;  %v56_v16 = vld [vmem:[#allocation3 + $0x28] sm:$0xff]  ;;  %v57_v17 = vld [vmem:[#allocation3 + $0x30] sm:$0xff]  ;;  %v58_v18 = vld [vmem:[#allocation3 + $0x38] sm:$0xff] }
  0x3d   :  { %v59_v19 = vld [vmem:[#allocation3 + $0x40] sm:$0xff]  ;;  %v60_v20 = vld [vmem:[#allocation3 + $0x48] sm:$0xff]  ;;  %v61_v21 = vld [vmem:[#allocation3 + $0x50] sm:$0xff] }
  0x3e   :  { %v62_v22 = vld [vmem:[#allocation3 + $0x58] sm:$0xff]  ;;  %v63_v23 = vld [vmem:[#allocation3 + $0x60] sm:$0xff]  ;;  %v64_v24 = vld [vmem:[#allocation3 + $0x68] sm:$0xff] }
  0x3f   :  { %856 = vmatpush1.bf16.msra.mxu0 %v855_v50  ;;  %888 = vmatpush3.bf16.msra.mxu1 %v885_v45  ;;  %v65_v25 = vld [vmem:[#allocation3 + $0x70] sm:$0xff]  ;;  %v66_v26 = vld [vmem:[#allocation3 + $0x78] sm:$0xff] }
  0x40   :  { %858 = vmatprep.subr.bf16.mxu0 %v857_v52  ;;  %890 = vmatprep.subr.bf16.mxu1 %v889_v55  ;;  %v653_v28 = vld [vmem:[#allocation2] sm:$0x1] }
  0x41   :  { %656 = vperm.xlu0 %936, %v653_v28   ;;  %v115_v33 = vld [vmem:[%s1315_s2] sm:$0x7] }
  0x42   :  { %v1166_v35 = vrot.slane %v115_v33, %v123_v32  ;;  %v1168_v36 = vrot.slane %v115_v33, %v127_v34 }
  0x43   :  { %860 = vmatpush1.bf16.msra.mxu0 %v859_v60  ;;  %892 = vmatpush3.bf16.msra.mxu1 %v889_v55 }
  0x44   :  { %862 = vmatprep.subr.bf16.mxu0 %v861_v61  ;;  %894 = vmatprep.subr.bf16.mxu1 %v893_v0 }
  0x47   :  { %864 = vmatpush1.bf16.msra.mxu0 %v863_v6  ;;  %896 = vmatpush3.bf16.msra.mxu1 %v893_v0 }
  0x48   :  { %866 = vmatprep.subr.bf16.mxu0 %v865_v7  ;;  %898 = vmatprep.subr.bf16.mxu1 %v897_v10 }
  0x4b   :  { %868 = vmatpush1.bf16.msra.mxu0 %v867_v11  ;;  %900 = vmatpush3.bf16.msra.mxu1 %v897_v10 }
  0x4c   :  { %901 = vmatprep.subr.bf16.mxu0 %v1080_v27 }
  0x4e   :  { %197 = vmatmul.mubr.f32.vlgmr.msra.gmra.mrb[0].mxu0 %v51_v51  ;;  %779 = vmatmul.mubr.f32.vlgmr.msra.gmra.mrb[0].mxu1 %v52_v12 }
  0x4f   :  { %202 = vmatprep.mubr.f32.mxu0 %v1079_v1  ;;  %781 = vmatprep.mubr.f32.mxu1 %v53_v13 }
  0x52   :  { %203 = vmatmul.mubr.f32.gmra.mrb[2].mxu0 %v52_v12  ;;  %782 = vmatmul.mubr.f32.gmra.mrb[2].mxu1 %v54_v14  ;;  %v119_v12 = vsub.s32 0, %v1159_v31 }
  0x53   :  { %208 = vmatprep.mubr.f32.mxu0 %v1079_v1  ;;  %784 = vmatprep.mubr.f32.mxu1 %v55_v15 }
  0x56   :  { %209 = vmatmul.mubr.f32.gmra.mrb[4].mxu0 %v53_v13  ;;  %785 = vmatmul.mubr.f32.gmra.mrb[4].mxu1 %v56_v16 }
  0x57   :  { %214 = vmatprep.mubr.f32.mxu0 %v1079_v1  ;;  %787 = vmatprep.mubr.f32.mxu1 %v57_v17 }
  0x5a   :  { %215 = vmatmul.mubr.f32.gmra.mrb[6].mxu0 %v54_v14  ;;  %788 = vmatmul.mubr.f32.gmra.mrb[6].mxu1 %v58_v18 }
  0x5b   :  { %220 = vmatprep.mubr.f32.mxu0 %v1079_v1  ;;  %790 = vmatprep.mubr.f32.mxu1 %v59_v19 }
  0x5e   :  { %221 = vmatmul.mubr.f32.gmra.mrb[8].mxu0 %v55_v15  ;;  %791 = vmatmul.mubr.f32.gmra.mrb[8].mxu1 %v60_v20 }
  0x5f   :  { %226 = vmatprep.mubr.f32.mxu0 %v1079_v1  ;;  %793 = vmatprep.mubr.f32.mxu1 %v61_v21 }
  0x62   :  { %227 = vmatmul.mubr.f32.gmra.mrb[10].mxu0 %v56_v16  ;;  %794 = vmatmul.mubr.f32.gmra.mrb[10].mxu1 %v62_v22 }
  0x63   :  { %232 = vmatprep.mubr.f32.mxu0 %v1079_v1  ;;  %796 = vmatprep.mubr.f32.mxu1 %v63_v23 }
  0x66   :  { %233 = vmatmul.mubr.f32.gmra.mrb[12].mxu0 %v57_v17  ;;  %797 = vmatmul.mubr.f32.gmra.mrb[12].mxu1 %v64_v24 }
  0x67   :  { %238 = vmatprep.mubr.f32.mxu0 %v1079_v1  ;;  %799 = vmatprep.mubr.f32.mxu1 %v65_v25 }
  0x6a   :  { %239 = vmatmul.mubr.f32.gmra.mrb[14].mxu0 %v58_v18  ;;  %800 = vmatmul.mubr.f32.gmra.mrb[14].mxu1 %v66_v26 }
  0x6b   :  { %244 = vmatprep.mubr.f32.mxu0 %v1079_v1 }
  0x6e   :  { %245 = vmatmul.mubr.f32.gmra.mrb[16].mxu0 %v59_v19 }
  0x6f   :  { %250 = vmatprep.mubr.f32.mxu0 %v1079_v1 }
  0x72   :  { %251 = vmatmul.mubr.f32.gmra.mrb[18].mxu0 %v60_v20 }
  0x73   :  { %256 = vmatprep.mubr.f32.mxu0 %v1079_v1 }
  0x76   :  { %257 = vmatmul.mubr.f32.gmra.mrb[20].mxu0 %v61_v21 }
  0x77   :  { %262 = vmatprep.mubr.f32.mxu0 %v1079_v1 }
  0x7a   :  { %263 = vmatmul.mubr.f32.gmra.mrb[22].mxu0 %v62_v22 }
  0x7b   :  { %268 = vmatprep.mubr.f32.mxu0 %v1079_v1 }
  0x7e   :  { %269 = vmatmul.mubr.f32.gmra.mrb[24].mxu0 %v63_v23  ;;  %v1203_v23 = vrot.slane %v115_v33, %v119_v12 }
  0x7f   :  { %274 = vmatprep.mubr.f32.mxu0 %v1079_v1 }
  0x82   :  { %275 = vmatmul.mubr.f32.gmra.mrb[26].mxu0 %v64_v24 }
  0x83   :  { %280 = vmatprep.mubr.f32.mxu0 %v1079_v1 }
  0x86   :  { %281 = vmatmul.mubr.f32.gmra.mrb[28].mxu0 %v65_v25 }
  0x87   :  { %286 = vmatprep.mubr.f32.mxu0 %v1079_v1 }
  0x8a   :  { %287 = vmatmul.mubr.f32.gmra.mrb[30].mxu0 %v66_v26 }
  0x8b   :  { %834 = vmatprep.mubr.msk.f32.mxu0 %vm1081_vm0, %v1079_v1 }
 0x121   :  { %v1170_v1 = vpop.f32.mrb[0].mxu0  ;;  %v780_v37 = vpop.f32.mrb[0].mxu1 }
 0x122   :  { %v200_v38 = vpop.f32.mrb[1].mxu0  ;;  %v359_v40 = vpop.f32.mrb[1].mxu1  ;;  %v365_v42 = vadd.f32 %v780_v37, %v1168_v36  ;;  %v199_v33 = vadd.f32 %v1170_v1, %v1203_v23 }
 0x123   :  { %v201_v39 = vadd.f32 %v200_v38, %v1166_v35  ;;  %v360_v41 = vadd.f32 %v359_v40, %v1168_v36 }
 0x124   :  { %v438_v1 = vmax.f32 %v199_v33, 0.0 }
 0x125   :  { %v1175_v43 = vpop.f32.mrb[2].mxu0  ;;  %v454_v44 = vmul.f32 %v360_v41, %v201_v39  ;;  %v783_v46 = vpop.f32.mrb[2].mxu1 }
 0x126   :  { %v206_v45 = vpop.f32.mrb[3].mxu0  ;;  %v369_v48 = vpop.f32.mrb[3].mxu1  ;;  %v375_v58 = vadd.f32 %v783_v46, %v1168_v36 }
 0x127   :  { %v207_v47 = vadd.f32 %v206_v45, %v1166_v35  ;;  %v681_v49 = vmul.f32 -1.442695, %v454_v44  ;;  %v370_v52 = vadd.f32 %v369_v48, %v1168_v36 }
 0x129   :  { %v455_v50 = vmul.f32 %v365_v42, %v207_v47  ;;  %v1178_v51 = vpop.f32.mrb[4].mxu0  ;;  %937 = vpow2.f32 %v681_v49  ;;  %v786_v54 = vpop.f32.mrb[4].mxu1  ;;  %v205_v47 = vadd.f32 %v1175_v43, %v1203_v23 }
 0x12a   :  { %v212_v53 = vpop.f32.mrb[5].mxu0  ;;  %v379_v57 = vpop.f32.mrb[5].mxu1  ;;  %v385_v14 = vadd.f32 %v786_v54, %v1168_v36 }
 0x12b   :  { %v682_v55 = vmul.f32 -1.442695, %v455_v50  ;;  %v213_v56 = vadd.f32 %v212_v53, %v1166_v35  ;;  %v380_v5 = vadd.f32 %v379_v57, %v1168_v36  ;;  %v211_v57 = vadd.f32 %v1178_v51, %v1203_v23 }
 0x12d   :  { %939 = vpow2.f32 %v682_v55  ;;  %v456_v59 = vmul.f32 %v370_v52, %v213_v56  ;;  %v1183_v60 = vpop.f32.mrb[6].mxu0  ;;  %v789_v62 = vpop.f32.mrb[6].mxu1 }
 0x12e   :  { %v218_v61 = vpop.f32.mrb[7].mxu0  ;;  %v389_v2 = vpop.f32.mrb[7].mxu1  ;;  %v395_v40 = vadd.f32 %v789_v62, %v1168_v36 }
 0x12f   :  { %v683_v63 = vmul.f32 -1.442695, %v456_v59  ;;  %v219_v0 = vadd.f32 %v218_v61, %v1166_v35  ;;  %v390_v28 = vadd.f32 %v389_v2, %v1168_v36  ;;  %v439_v61 = vmax.f32 %v205_v47, 0.0 }
 0x131   :  { %941 = vpow2.f32 %v683_v63  ;;  %v457_v3 = vmul.f32 %v375_v58, %v219_v0  ;;  %v1186_v4 = vpop.f32.mrb[8].mxu0  ;;  %v1189_v7 = vpop.f32.mrb[8].mxu1 }
 0x132   :  { %v224_v6 = vpop.f32.mrb[9].mxu0  ;;  %v399_v10 = vpop.f32.mrb[9].mxu1 }
 0x133   :  { %v684_v8 = vmul.f32 -1.442695, %v457_v3  ;;  %v225_v9 = vadd.f32 %v224_v6, %v1166_v35  ;;  %v938_v11 = vpop.eup %937  ;;  %v400_v56 = vadd.f32 %v399_v10, %v1168_v36  ;;  %v405_v3 = vadd.f32 %v1189_v7, %v1168_v36 }
 0x134   :  { %v518_v13 = vadd.f32 1.0, %v938_v11  ;;  %v217_v11 = vadd.f32 %v1183_v60, %v1203_v23 }
 0x135   :  { %943 = vpow2.f32 %v684_v8  ;;  %v458_v15 = vmul.f32 %v380_v5, %v225_v9  ;;  %v1194_v16 = vpop.f32.mrb[10].mxu0  ;;  %v1196_v18 = vpop.f32.mrb[10].mxu1  ;;  %v440_v9 = vmax.f32 %v211_v57, 0.0 }
 0x136   :  { %v230_v17 = vpop.f32.mrb[11].mxu0  ;;  %945 = vrcp.f32 %v518_v13  ;;  %v1199_v22 = vpop.f32.mrb[11].mxu1  ;;  %v229_v47 = vadd.f32 %v1194_v16, %v1203_v23 }
 0x137   :  { %v940_v19 = vpop.eup %939  ;;  %v685_v20 = vmul.f32 -1.442695, %v458_v15  ;;  %v231_v21 = vadd.f32 %v230_v17, %v1166_v35 }
 0x138   :  { %v519_v24 = vadd.f32 1.0, %v940_v19 }
 0x139   :  { %947 = vpow2.f32 %v685_v20  ;;  %v459_v25 = vmul.f32 %v385_v14, %v231_v21  ;;  %v1205_v26 = vpop.f32.mrb[12].mxu0  ;;  %v1208_v30 = vpop.f32.mrb[12].mxu1  ;;  %v410_v21 = vadd.f32 %v1199_v22, %v1168_v36 }
 0x13a   :  { %949 = vrcp.f32 %v519_v24  ;;  %v236_v29 = vpop.f32.mrb[13].mxu0  ;;  %v1211_v38 = vpop.f32.mrb[13].mxu1 }
 0x13b   :  { %v942_v32 = vpop.eup %941  ;;  %v686_v34 = vmul.f32 -1.442695, %v459_v25  ;;  %v237_v37 = vadd.f32 %v236_v29, %v1166_v35  ;;  %v223_v25 = vadd.f32 %v1186_v4, %v1203_v23  ;;  %v441_v29 = vmax.f32 %v217_v11, 0.0 }
 0x13c   :  { %v520_v39 = vadd.f32 1.0, %v942_v32 }
 0x13d   :  { %951 = vpow2.f32 %v686_v34  ;;  %v460_v41 = vmul.f32 %v390_v28, %v237_v37  ;;  %v1216_v42 = vpop.f32.mrb[14].mxu0  ;;  %v1218_v45 = vpop.f32.mrb[14].mxu1  ;;  %v442_v4 = vmax.f32 %v223_v25, 0.0 }
 0x13e   :  { %953 = vrcp.f32 %v520_v39  ;;  %v242_v44 = vpop.f32.mrb[15].mxu0  ;;  %v1223_v50 = vpop.f32.mrb[15].mxu1  ;;  %v415_v39 = vadd.f32 %v1196_v18, %v1168_v36 }
 0x13f   :  { %v944_v46 = vpop.eup %943  ;;  %v687_v48 = vmul.f32 -1.442695, %v460_v41  ;;  %v243_v49 = vadd.f32 %v242_v44, %v1166_v35 }
 0x140   :  { %v521_v52 = vadd.f32 1.0, %v944_v46  ;;  %v946_v53 = vpop.eup %945 }
 0x141   :  { %955 = vpow2.f32 %v687_v48  ;;  %v461_v54 = vmul.f32 %v395_v40, %v243_v49  ;;  %v1225_v55 = vpop.f32.mrb[16].mxu0  ;;  %v566_v43 = vmul.f32 %v946_v53, %v438_v1 }
 0x142   :  { %957 = vrcp.f32 %v521_v52  ;;  %v248_v58 = vpop.f32.mrb[17].mxu0 }
 0x143   :  { %v948_v59 = vpop.eup %947  ;;  %v688_v62 = vmul.f32 -1.442695, %v461_v54  ;;  %v249_v63 = vadd.f32 %v248_v58, %v1166_v35  ;;  %v235_v58 = vadd.f32 %v1205_v26, %v1203_v23 }
 0x144   :  { %v950_v0 = vpop.eup %949  ;;  %v522_v2 = vadd.f32 1.0, %v948_v59  ;;  %v443_v59 = vmax.f32 %v229_v47, 0.0 }
 0x145   :  { %959 = vpow2.f32 %v688_v62  ;;  %v462_v5 = vmul.f32 %v400_v56, %v249_v63  ;;  %v1233_v6 = vpop.f32.mrb[18].mxu0  ;;  %v567_v8 = vmul.f32 %v950_v0, %v439_v61  ;;  %v420_v56 = vadd.f32 %v1211_v38, %v1168_v36 }
 0x146   :  { %961 = vrcp.f32 %v522_v2  ;;  %v254_v51 = vpop.f32.mrb[19].mxu0  ;;  %v425_v2 = vadd.f32 %v1208_v30, %v1168_v36  ;;  %v444_v26 = vmax.f32 %v235_v58, 0.0 }
 0x147   :  { %v952_v10 = vpop.eup %951  ;;  %v689_v13 = vmul.f32 -1.442695, %v462_v5  ;;  %v255_v14 = vadd.f32 %v254_v51, %v1166_v35  ;;  %v902_v15 = vpack.c.bf16 %v567_v8, %v566_v43  ;;  %v241_v51 = vadd.f32 %v1216_v42, %v1203_v23 }
 0x148   :  { %v954_v17 = vpop.eup %953  ;;  %v523_v19 = vadd.f32 1.0, %v952_v10 }
 0x149   :  { %963 = vpow2.f32 %v689_v13  ;;  %v463_v20 = vmul.f32 %v405_v3, %v255_v14  ;;  %v1238_v7 = vpop.f32.mrb[20].mxu0  ;;  %903 = vmatpush3.bf16.xpose.msra.mxu0 %v902_v15  ;;  %v568_v24 = vmul.f32 %v954_v17, %v440_v9  ;;  %v445_v25 = vmax.f32 %v241_v51, 0.0 }
 0x14a   :  { %965 = vrcp.f32 %v523_v19  ;;  %v260_v60 = vpop.f32.mrb[21].mxu0  ;;  %904 = vmatprep.subr.bf16.mxu0 %v1080_v27  ;;  %v430_v19 = vadd.f32 %v1223_v50, %v1168_v36 }
 0x14b   :  { %v956_v28 = vpop.eup %955  ;;  %v690_v32 = vmul.f32 -1.442695, %v463_v20  ;;  %v261_v34 = vadd.f32 %v260_v60, %v1166_v35 }
 0x14c   :  { %v958_v37 = vpop.eup %957  ;;  %v524_v33 = vadd.f32 1.0, %v956_v28 }
 0x14d   :  { %967 = vpow2.f32 %v690_v32  ;;  %v464_v22 = vmul.f32 %v410_v21, %v261_v34  ;;  %v1248_v40 = vpop.f32.mrb[22].mxu0  ;;  %v569_v41 = vmul.f32 %v958_v37, %v441_v29  ;;  %v247_v21 = vadd.f32 %v1225_v55, %v1203_v23 }
 0x14e   :  { %969 = vrcp.f32 %v524_v33  ;;  %v266_v44 = vpop.f32.mrb[23].mxu0  ;;  %v435_v34 = vadd.f32 %v1218_v45, %v1168_v36  ;;  %v265_v58 = vadd.f32 %v1248_v40, %v1203_v23 }
 0x14f   :  { %v960_v46 = vpop.eup %959  ;;  %v691_v48 = vmul.f32 -1.442695, %v464_v22  ;;  %v267_v49 = vadd.f32 %v266_v44, %v1166_v35  ;;  %v905_v1 = vpack.c.bf16 %v569_v41, %v568_v24  ;;  %v253_v41 = vadd.f32 %v1233_v6, %v1203_v23 }
 0x150   :  { %v962_v52 = vpop.eup %961  ;;  %v525_v53 = vadd.f32 1.0, %v960_v46 }
 0x151   :  { %971 = vpow2.f32 %v691_v48  ;;  %v465_v54 = vmul.f32 %v415_v39, %v267_v49  ;;  %v1253_v18 = vpop.f32.mrb[24].mxu0  ;;  %906 = vmatpush3.bf16.xpose.msra.mxu0 %v905_v1  ;;  %v570_v57 = vmul.f32 %v962_v52, %v442_v4  ;;  %v446_v39 = vmax.f32 %v247_v21, 0.0 }
 0x152   :  { %973 = vrcp.f32 %v525_v53  ;;  %v272_v16 = vpop.f32.mrb[25].mxu0  ;;  %907 = vmatprep.subr.bf16.mxu0 %v1080_v27  ;;  %v447_v1 = vmax.f32 %v253_v41, 0.0  ;;  %v259_v52 = vadd.f32 %v1238_v7, %v1203_v23 }
 0x153   :  { %v964_v43 = vpop.eup %963  ;;  %v692_v61 = vmul.f32 -1.442695, %v465_v54  ;;  %v273_v62 = vadd.f32 %v272_v16, %v1166_v35 }
 0x154   :  { %v966_v63 = vpop.eup %965  ;;  %v526_v0 = vadd.f32 1.0, %v964_v43 }
 0x155   :  { %975 = vpow2.f32 %v692_v61  ;;  %v466_v38 = vmul.f32 %v420_v56, %v273_v62  ;;  %v1263_v3 = vpop.f32.mrb[26].mxu0  ;;  %v571_v5 = vmul.f32 %v966_v63, %v443_v59  ;;  %v449_v62 = vmax.f32 %v265_v58, 0.0 }
 0x156   :  { %977 = vrcp.f32 %v526_v0  ;;  %v278_v8 = vpop.f32.mrb[27].mxu0  ;;  %v271_v63 = vadd.f32 %v1253_v18, %v1203_v23  ;;  %v277_v40 = vadd.f32 %v1263_v3, %v1203_v23 }
 0x157   :  { %v968_v9 = vpop.eup %967  ;;  %v693_v10 = vmul.f32 -1.442695, %v466_v38  ;;  %v279_v11 = vadd.f32 %v278_v8, %v1166_v35  ;;  %v908_v13 = vpack.c.bf16 %v571_v5, %v570_v57  ;;  %v448_v57 = vmax.f32 %v259_v52, 0.0 }
 0x158   :  { %v970_v14 = vpop.eup %969  ;;  %v527_v15 = vadd.f32 1.0, %v968_v9 }
 0x159   :  { %979 = vpow2.f32 %v693_v10  ;;  %v467_v17 = vmul.f32 %v425_v2, %v279_v11  ;;  %v1268_v30 = vpop.f32.mrb[28].mxu0  ;;  %909 = vmatpush3.bf16.xpose.msra.mxu0 %v908_v13  ;;  %v572_v20 = vmul.f32 %v970_v14, %v444_v26  ;;  %v450_v26 = vmax.f32 %v271_v63, 0.0 }
 0x15a   :  { %981 = vrcp.f32 %v527_v15  ;;  %v284_v42 = vpop.f32.mrb[29].mxu0  ;;  %910 = vmatprep.subr.bf16.mxu0 %v1080_v27  ;;  %v451_v11 = vmax.f32 %v277_v40, 0.0  ;;  %v283_v18 = vadd.f32 %v1268_v30, %v1203_v23  ;;  %v582_v30 = vld [vmem:[%s1316_s3] sm:$0xff] }
 0x15b   :  { %v972_v24 = vpop.eup %971  ;;  %v694_v60 = vmul.f32 -1.442695, %v467_v17  ;;  %v285_v28 = vadd.f32 %v284_v42, %v1166_v35 }
 0x15c   :  { %v974_v29 = vpop.eup %973  ;;  %v528_v32 = vadd.f32 1.0, %v972_v24  ;;  %v452_v15 = vmax.f32 %v283_v18, 0.0 }
 0x15d   :  { %983 = vpow2.f32 %v694_v60  ;;  %v468_v50 = vmul.f32 %v430_v19, %v285_v28  ;;  %v288_v37 = vpop.f32.mrb[30].mxu0  ;;  %v573_v33 = vmul.f32 %v974_v29, %v445_v25  ;;  %v657_v60 = vpop.permute.xlu0 %656 }
 0x15e   :  { %985 = vrcp.f32 %v528_v32  ;;  %v290_v55 = vpop.f32.mrb[31].mxu0  ;;  %v289_v17 = vadd.f32 %v288_v37, %v1203_v23  ;;  %v662_v23 = vrot.slane %v657_v60, %v119_v12 }
 0x15f   :  { %v976_v22 = vpop.eup %975  ;;  %v695_v4 = vmul.f32 -1.442695, %v468_v50  ;;  %v291_v44 = vadd.f32 %v290_v55, %v1166_v35  ;;  %v911_v46 = vpack.c.bf16 %v573_v33, %v572_v20 }
 0x160   :  { %v978_v47 = vpop.eup %977  ;;  %v529_v48 = vadd.f32 1.0, %v976_v22  ;;  %v453_v21 = vmax.f32 %v289_v17, 0.0 }
 0x161   :  { %987 = vpow2.f32 %v695_v4  ;;  %v469_v49 = vmul.f32 %v435_v34, %v291_v44  ;;  %912 = vmatpush3.bf16.xpose.msra.mxu0 %v911_v46  ;;  %v574_v36 = vmul.f32 %v978_v47, %v446_v39 }
 0x162   :  { %989 = vrcp.f32 %v529_v48  ;;  %913 = vmatprep.subr.bf16.mxu0 %v1080_v27 }
 0x163   :  { %v980_v45 = vpop.eup %979  ;;  %v696_v53 = vmul.f32 -1.442695, %v469_v49 }
 0x164   :  { %v982_v6 = vpop.eup %981  ;;  %v530_v54 = vadd.f32 1.0, %v980_v45 }
 0x165   :  { %991 = vpow2.f32 %v696_v53  ;;  %v575_v35 = vmul.f32 %v982_v6, %v447_v1 }
 0x166   :  { %993 = vrcp.f32 %v530_v54 }
 0x167   :  { %v984_v56 = vpop.eup %983  ;;  %v914_v16 = vpack.c.bf16 %v575_v35, %v574_v36 }
 0x168   :  { %v986_v43 = vpop.eup %985  ;;  %v531_v59 = vadd.f32 1.0, %v984_v56 }
 0x169   :  { %915 = vmatpush3.bf16.xpose.msra.mxu0 %v914_v16  ;;  %v576_v61 = vmul.f32 %v986_v43, %v448_v57 }
 0x16a   :  { %995 = vrcp.f32 %v531_v59  ;;  %916 = vmatprep.subr.bf16.mxu0 %v1080_v27 }
 0x16b   :  { %v988_v7 = vpop.eup %987 }
 0x16c   :  { %v990_v0 = vpop.eup %989  ;;  %v532_v2 = vadd.f32 1.0, %v988_v7 }
 0x16d   :  { %v577_v38 = vmul.f32 %v990_v0, %v449_v62 }
 0x16e   :  { %997 = vrcp.f32 %v532_v2 }
 0x16f   :  { %v992_v5 = vpop.eup %991  ;;  %v917_v8 = vpack.c.bf16 %v577_v38, %v576_v61 }
 0x170   :  { %v994_v9 = vpop.eup %993  ;;  %v533_v51 = vadd.f32 1.0, %v992_v5 }
 0x171   :  { %918 = vmatpush3.bf16.xpose.msra.mxu0 %v917_v8  ;;  %v578_v10 = vmul.f32 %v994_v9, %v450_v26 }
 0x172   :  { %999 = vrcp.f32 %v533_v51  ;;  %919 = vmatprep.subr.bf16.mxu0 %v1080_v27 }
 0x174   :  { %v996_v13 = vpop.eup %995 }
 0x175   :  { %v579_v14 = vmul.f32 %v996_v13, %v451_v11 }
 0x177   :  { %v920_v19 = vpack.c.bf16 %v579_v14, %v578_v10 }
 0x178   :  { %v998_v20 = vpop.eup %997 }
 0x179   :  { %921 = vmatpush3.bf16.xpose.msra.mxu0 %v920_v19  ;;  %v580_v3 = vmul.f32 %v998_v20, %v452_v15 }
 0x17a   :  { %922 = vmatprep.subr.bf16.mxu0 %v1080_v27 }
 0x17c   :  { %v1000_v42 = vpop.eup %999 }
 0x17d   :  { %v581_v24 = vmul.f32 %v1000_v42, %v453_v21 }
 0x17f   :  { %v923_v25 = vpack.c.bf16 %v581_v24, %v580_v3 }
 0x181   :  { %924 = vmatpush3.bf16.xpose.msra.mxu0 %v923_v25 }
 0x188   :  { %835 = vmatmul.mubr.f32.vlgmr.msra.gmra.mrb[32].mxu0 %v582_v30 }
 0x25b   :  { %v649_v28 = vpop.f32.mrb[32].mxu0 }
 0x25c   :  { %v663_v29 = vadd.f32 %v662_v23, %v649_v28  ;;  %v836_v32 = vpop.f32.mrb[33].mxu0 }
 0x25e   :  { %664 = vst [vmem:[#allocation8] sm:$0x1] %v663_v29 }
 0x25f   :  { %1056 = shalt.err (!%p1053_p6)
}
 0x260   :  { %s1057_s28 = scalar_lea.hbm %s1318_s5, 16 }
 0x261   :  { %p1058_p7 = scmp.ne.s32.totalorder %s1318_s5, %s1057_s28  ;;  %p1061_p8 = scmp.lt.u32.totalorder %s1057_s28, %s1318_s5 }
 0x263   :  { %p1063_p9 = pnand %p1061_p8, %p1058_p7 }
 0x265   :  { %1066 = shalt.err (!%p1063_p9)
}
 0x266   :  { %674 = dma.vmem_to_hbm [thread:$0]  %s672_s24, 16, %s1318_s5, [#allocation5]  }
 0x267   :  { %1071 = dma.done.wait [#allocation5], 16  }
 0x268   :  { %1072 = vsyncadd [#allocation5], 4294967280 }
 0x269   :  { %678 = vsyncpa [#allocation4], 1 }
 0x26a   :  { %679 = vsyncpa [#allocation7], 1 }
 0x26b   :  { %680 = vsyncpa [#allocation5], 1 }

</bundles_post_ra>
